<compile_context>
chip_gen: v7x
topology: tpu7x:2x2x1
jax: 0.10.0
libtpu: 0.0.40
codegen_flags: <defaults>
</compile_context>

<pallas_src>
import numpy as np
import jax
import jax.numpy as jnp
from jax.experimental import pallas as pl
from jax.experimental.pallas import tpu as pltpu


def _round_up(x, m):
    return ((x + m - 1) // m) * m


# ----------------------------------------------------------------------------
# Pallas kernel factory: fused K-tap conv tile (one MXU dot) + shift + LeakyReLU
# ----------------------------------------------------------------------------
def _make_conv_kernel(C_in, C_out, K, stride, TT, KC_pad):
    # Static tap -> (phase, lane offset) map and per-phase halo extents.
    taps = [(k % stride, k // stride) for k in range(K)]
    halo = [0] * stride
    for r, d in taps:
        halo[r] = max(halo[r], d)

    def kernel(x_ref, w_ref, shift_ref, o_ref):
        # x_ref:     (1, stride*C_in, L)   phase-decomposed padded input (whole time axis)
        # w_ref:     (C_out, KC_pad)       BN-scale-folded weights, tap-major columns
        # shift_ref: (C_out, 1)            folded bias/BN shift (f32)
        # o_ref:     (1, C_out, TT)        lane-dense output tile
        j = pl.program_id(1)
        base = pl.multiple_of(j * TT, TT)          # TT is a multiple of 128 -> aligned

        # One aligned slab load per stride phase (not per tap); the d-shifted
        # views below are value-level slices (XLU lane shifts, overlap with MXU).
        slabs = [x_ref[0, pl.ds(r * C_in, C_in), pl.ds(base, TT + halo[r])]
                 for r in range(stride)]

        # Stack the K shifted views (tap-major) into one (KC_pad, TT) operand.
        pieces = [slabs[r][:, d:d + TT] for (r, d) in taps]
        if KC_pad > K * C_in:                      # pad contraction dim to a multiple of 8
            pieces.append(jnp.zeros((KC_pad - K * C_in, TT), slabs[0].dtype))
        xcat = pieces[0] if len(pieces) == 1 else jnp.concatenate(pieces, axis=0)

        # Single MXU contraction over K*C_in with f32 accumulation, then the
        # cheap epilogue: per-channel shift + LeakyReLU(0.1) as a max.
        y = jnp.dot(w_ref[...], xcat, preferred_element_type=jnp.float32)
        y = y + shift_ref[...]
        o_ref[0] = jnp.maximum(y, 0.1 * y).astype(o_ref.dtype)

    return kernel


# ----------------------------------------------------------------------------
# One encoder layer: Conv1d + (inference) BatchNorm1d + LeakyReLU(0.1)
# ----------------------------------------------------------------------------
def conv_bn_lrelu_layer(x_bct, weight, bias, gamma, beta, mean, var,
                        stride, padding, *, eps=1e-5,
                        out_dtype=jnp.bfloat16, compute_dtype=jnp.bfloat16):
    """x_bct: [B, C_in, T]  ->  [B, C_out, T_out]   (NCT, time on lanes)."""
    B, C_in, T = x_bct.shape
    C_out, _, K = weight.shape
    s = stride
    T_out = (T + 2 * padding - K) // s + 1

    # Register-pressure-aware time-tile: lane-dense (>=128), larger tiles only
    # where the (C_out, TT) f32 epilogue value stays well inside the vreg file.
    if C_out <= 32:
        tt_cap = 1024
    elif C_out <= 64:
        tt_cap = 512
    else:
        tt_cap = 256
    TT = min(tt_cap, _round_up(max(T_out, 1), 128))
    NT = pl.cdiv(T_out, TT)
    T_out_pad = NT * TT
    L = T_out_pad + (K - 1) // s          # per-phase length needed by the kernel
    total = L * s

    # Conv zero-padding on the left; zero-pad (or trim) the right to L*s.
    x_full = x_bct.astype(compute_dtype)
    right = max(total - (padding + T), 0)
    x_full = jnp.pad(x_full, ((0, 0), (0, 0), (padding, right)))
    if padding + T > total:
        x_full = x_full[:, :, :total]      # tail never read by any valid output

    if s == 1:
        # Phase decomposition is the identity for stride-1 layers: skip it.
        x_ph = x_full                                        # (B, C_in, L)
    else:
        # x_ph[b, r*C_in + c, m] = x_padded[b, c, m*s + r], so tap k of output t
        # reads phase (k % s) at unit-stride position t + k//s.
        x_ph = (x_full.reshape(B, C_in, L, s)
                      .transpose(0, 3, 1, 2)
                      .reshape(B, s * C_in, L))              # (B, s*C_in, L)

    # Fold conv bias + inference BatchNorm into weight scale / per-channel shift.
    scale = gamma * jax.lax.rsqrt(var + eps)                 # [C_out]
    shift = beta + (bias - mean) * scale                     # [C_out]
    w_folded = weight * scale[:, None, None]                 # [C_out, C_in, K]
    KC = K * C_in
    KC_pad = _round_up(KC, 8)                                # MXU-friendly contraction
    w2d = jnp.transpose(w_folded, (0, 2, 1)).reshape(C_out, KC)   # tap-major columns
    if KC_pad > KC:
        w2d = jnp.pad(w2d, ((0, 0), (0, KC_pad - KC)))
    w2d = w2d.astype(compute_dtype)
    shift2 = shift.reshape(C_out, 1).astype(jnp.float32)

    kernel = _make_conv_kernel(C_in, C_out, K, s, TT, KC_pad)

    # Explicit VMEM budget from the actual (double-buffered) block footprint,
    # capped to stay safe on v7x (64 MiB physical).
    esz = jnp.dtype(compute_dtype).itemsize
    osz = jnp.dtype(out_dtype).itemsize
    vmem_need = (2 * x_ph.shape[1] * L * esz           # whole-time-axis input block
                 + 2 * C_out * KC_pad * esz            # folded weights
                 + 2 * max(C_out, 8) * 128 * 4         # shift (lane-padded)
                 + 2 * C_out * TT * osz)               # output tile
    vmem_limit = int(min(max(vmem_need + (4 << 20), 16 << 20), 48 << 20))

    out = pl.pallas_call(
        kernel,
        out_shape=jax.ShapeDtypeStruct((B, C_out, T_out_pad), out_dtype),
        grid=(B, NT),
        in_specs=[
            # whole (phase-decomposed) time axis, resident per batch element
            pl.BlockSpec((1, x_ph.shape[1], L), lambda b, j: (b, 0, 0)),
            # weights & shift: constant index map -> stay VMEM-resident
            pl.BlockSpec((C_out, KC_pad), lambda b, j: (0, 0)),
            pl.BlockSpec((C_out, 1), lambda b, j: (0, 0)),
        ],
        out_specs=pl.BlockSpec((1, C_out, TT), lambda b, j: (b, 0, j)),
        compiler_params=pltpu.CompilerParams(
            dimension_semantics=("parallel", "parallel"),
            vmem_limit_bytes=vmem_limit,
        ),
    )(x_ph, w2d, shift2)

    if T_out_pad != T_out:
        out = out[:, :, :T_out]
    return out


# ----------------------------------------------------------------------------
# FeatureEncoder wrapper
# ----------------------------------------------------------------------------
class FeatureEncoderPallas:
    def __init__(self, config, key):
        input_channels = config.get('input_channels', 1)
        base_channels = config.get('base_channels', 16)
        self.kernel_sizes = config.get('kernel_sizes', [7, 5, 3, 3])
        self.strides = config.get('strides', [2, 2, 1, 1])
        self.paddings = config.get('paddings', [3, 2, 1, 1])

        self.params = []
        in_ch = input_channels
        for i, k in enumerate(self.kernel_sizes):
            out_ch = base_channels * 2 ** i
            key, kw, kb, kg, kbt, km, kv = jax.random.split(key, 7)
            weight = 0.1 * jax.random.normal(kw, (out_ch, in_ch, k), jnp.float32)
            bias = 0.1 * jax.random.normal(kb, (out_ch,), jnp.float32)
            gamma = 1.0 + 0.1 * jax.random.normal(kg, (out_ch,), jnp.float32)
            beta = 0.1 * jax.random.normal(kbt, (out_ch,), jnp.float32)
            mean = 0.1 * jax.random.normal(km, (out_ch,), jnp.float32)
            var = jax.random.uniform(kv, (out_ch,), jnp.float32, 0.5, 1.5)
            self.params.append((weight, bias, gamma, beta, mean, var))
            in_ch = out_ch

        self.output_dim = base_channels * 2 ** (len(self.kernel_sizes) - 1)
        self._forward = jax.jit(self._forward_impl)

    def _forward_impl(self, x):
        # x: [B, C, T]  (PyTorch NCT layout) -- consumed directly, no transposes.
        n = len(self.params)
        for i, ((w, b, g, bt, m, v), s, p) in enumerate(
                zip(self.params, self.strides, self.paddings)):
            last = (i == n - 1)
            x = conv_bn_lrelu_layer(
                x, w, b, g, bt, m, v, s, p,
                out_dtype=jnp.float32 if last else jnp.bfloat16,
                compute_dtype=jnp.float32 if x.shape[1] == 1 else jnp.bfloat16)
            # Dropout: identity in inference (eval) mode.
        # TODO(synk): fuse all four layers into one pallas_call with cascaded
        # time halos and VMEM-resident intermediates (removes 3 HBM round
        # trips), and add a C_out-split grid axis so both v7x TensorCores stay
        # busy when B == 1 and the time grid collapses.
        return x  # [B, features, T_out]

    def __call__(self, x_bct):
        return self._forward(x_bct)


# ----------------------------------------------------------------------------
# Pure-JAX f32 reference (lax conv) for a numerical sanity check
# ----------------------------------------------------------------------------
def reference_forward(encoder, x_bct, eps=1e-5):
    x = x_bct
    for (w, b, g, bt, m, v), s, p in zip(encoder.params, encoder.strides, encoder.paddings):
        y = jax.lax.conv_general_dilated(
            x, w, window_strides=(s,), padding=[(p, p)],
            dimension_numbers=('NCH', 'OIH', 'NCH'))
        y = y + b[None, :, None]
        y = (y - m[None, :, None]) / jnp.sqrt(v[None, :, None] + eps)
        y = y * g[None, :, None] + bt[None, :, None]
        y = jnp.where(y > 0, y, 0.1 * y)
        x = y
    return x


if __name__ == "__main__":
    key = jax.random.PRNGKey(0)
    key, kx, kp = jax.random.split(key, 3)

    config = {
        'input_channels': 1,
        'base_channels': 16,
        'kernel_sizes': [7, 5, 3, 3],
        'strides': [2, 2, 1, 1],
        'paddings': [3, 2, 1, 1],
        'dropout': 0.2,
    }

    B, C_in, T = 2, config['input_channels'], 32
    x = jax.random.normal(kx, (B, C_in, T), jnp.float32)

    encoder = FeatureEncoderPallas(config, kp)

    out = jax.block_until_ready(encoder(x))

    # sanity: shape [B, output_dim, T_out]  -> (2, 128, 8) for this config
    assert out.shape == (B, encoder.output_dim, 8), out.shape

    ref = jax.block_until_ready(reference_forward(encoder, x))
    # bf16 activations/weights in layers 2-4 -> loose tolerance vs f32 reference
    np.testing.assert_allclose(np.asarray(out, np.float32),
                               np.asarray(ref, np.float32),
                               rtol=1e-1, atol=5e-2)

    print("KERNEL_OK")
</pallas_src>

<mosaic_0001>
module attributes {stable_mosaic.version = 11 : i64} {
  func.func @kernel(%arg0: i32, %arg1: i32, %arg2: memref<1x2x131xf32, #tpu.memory_space<vmem>>, %arg3: memref<16x8xf32, #tpu.memory_space<vmem>>, %arg4: memref<16x1xf32, #tpu.memory_space<vmem>>, %arg5: memref<1x16x128xbf16, #tpu.memory_space<vmem>>) attributes {dimension_semantics = [#tpu.dimension_semantics<parallel>, #tpu.dimension_semantics<parallel>], iteration_bounds = array<i64: 2, 1>, scalar_prefetch = 0 : i64, scratch_operands = 0 : i64, tpu.core_type = #tpu.core_type<tc>, window_params = [{transform_indices = @transform_0, window_bounds = array<i64: 1, 2, 131>}, {pipeline_mode = #tpu.pipeline_mode<synchronous>, transform_indices = @transform_1, window_bounds = array<i64: 16, 8>}, {pipeline_mode = #tpu.pipeline_mode<synchronous>, transform_indices = @transform_2, window_bounds = array<i64: 16, 1>}, {transform_indices = @transform_3, window_bounds = array<i64: 1, 16, 128>}]} {
    %c128_i32 = arith.constant 128 : i32
    %0 = arith.muli %arg1, %c128_i32 : i32
    %1 = tpu.assume_multiple %0, 128 : i32
    %c0 = arith.constant 0 : index
    %c0_0 = arith.constant 0 : index
    %2 = arith.index_cast %1 : i32 to index
    %3 = vector.load %arg2[%c0, %c0_0, %2] : memref<1x2x131xf32, #tpu.memory_space<vmem>>, vector<1x1x131xf32>
    %4 = vector.shape_cast %3 : vector<1x1x131xf32> to vector<1x131xf32>
    %c0_1 = arith.constant 0 : index
    %c1 = arith.constant 1 : index
    %5 = arith.index_cast %1 : i32 to index
    %6 = vector.load %arg2[%c0_1, %c1, %5] : memref<1x2x131xf32, #tpu.memory_space<vmem>>, vector<1x1x130xf32>
    %7 = vector.shape_cast %6 : vector<1x1x130xf32> to vector<1x130xf32>
    %8 = vector.extract_strided_slice %4 {offsets = [0, 0], sizes = [1, 128], strides = [1, 1]} : vector<1x131xf32> to vector<1x128xf32>
    %9 = vector.extract_strided_slice %7 {offsets = [0, 0], sizes = [1, 128], strides = [1, 1]} : vector<1x130xf32> to vector<1x128xf32>
    %10 = vector.extract_strided_slice %4 {offsets = [0, 1], sizes = [1, 128], strides = [1, 1]} : vector<1x131xf32> to vector<1x128xf32>
    %11 = vector.extract_strided_slice %7 {offsets = [0, 1], sizes = [1, 128], strides = [1, 1]} : vector<1x130xf32> to vector<1x128xf32>
    %12 = vector.extract_strided_slice %4 {offsets = [0, 2], sizes = [1, 128], strides = [1, 1]} : vector<1x131xf32> to vector<1x128xf32>
    %13 = vector.extract_strided_slice %7 {offsets = [0, 2], sizes = [1, 128], strides = [1, 1]} : vector<1x130xf32> to vector<1x128xf32>
    %14 = vector.extract_strided_slice %4 {offsets = [0, 3], sizes = [1, 128], strides = [1, 1]} : vector<1x131xf32> to vector<1x128xf32>
    %cst = arith.constant 0.000000e+00 : f32
    %15 = vector.broadcast %cst : f32 to vector<1x128xf32>
    %16 = tpu.concatenate %8, %9, %10, %11, %12, %13, %14, %15 in 0 : vector<1x128xf32>, vector<1x128xf32>, vector<1x128xf32>, vector<1x128xf32>, vector<1x128xf32>, vector<1x128xf32>, vector<1x128xf32>, vector<1x128xf32> -> vector<8x128xf32>
    %c0_2 = arith.constant 0 : index
    %c0_3 = arith.constant 0 : index
    %17 = vector.load %arg3[%c0_2, %c0_3] : memref<16x8xf32, #tpu.memory_space<vmem>>, vector<16x8xf32>
    %cst_4 = arith.constant dense<0.000000e+00> : vector<16x128xf32>
    %18 = tpu.matmul %17, %16, %cst_4 {dimension_numbers = #tpu.dot_dimension_numbers<[1], [0], [0], [1], [0, 0, 1, 1], [], []>} : vector<16x8xf32>, vector<8x128xf32>, vector<16x128xf32> -> vector<16x128xf32>
    %c0_5 = arith.constant 0 : index
    %c0_6 = arith.constant 0 : index
    %19 = vector.load %arg4[%c0_5, %c0_6] : memref<16x1xf32, #tpu.memory_space<vmem>>, vector<16x1xf32>
    %20 = vector.broadcast %19 : vector<16x1xf32> to vector<16x128xf32>
    %21 = arith.addf %18, %20 : vector<16x128xf32>
    %cst_7 = arith.constant 1.000000e-01 : f32
    %22 = vector.broadcast %cst_7 : f32 to vector<16x128xf32>
    %23 = arith.mulf %22, %21 : vector<16x128xf32>
    %24 = arith.maximumf %21, %23 : vector<16x128xf32>
    %25 = arith.truncf %24 : vector<16x128xf32> to vector<16x128xbf16>
    %c0_8 = arith.constant 0 : index
    %c0_9 = arith.constant 0 : index
    %c0_10 = arith.constant 0 : index
    %26 = vector.load %arg5[%c0_8, %c0_9, %c0_10] : memref<1x16x128xbf16, #tpu.memory_space<vmem>>, vector<1x16x128xbf16>
    %27 = vector.shape_cast %26 : vector<1x16x128xbf16> to vector<16x128xbf16>
    %28 = vector.shape_cast %25 : vector<16x128xbf16> to vector<1x16x128xbf16>
    tpu.vector_store %arg5[%c0_8, %c0_9, %c0_10], %28 {strides = array<i32>} : memref<1x16x128xbf16, #tpu.memory_space<vmem>>, vector<1x16x128xbf16>,
    return
  }
  func.func @transform_0(%arg0: i32, %arg1: i32) -> (i32, i32, i32) {
    %c0_i32 = arith.constant 0 : i32
    %c0_i32_0 = arith.constant 0 : i32
    %c0_i32_1 = arith.constant 0 : i32
    return %arg0, %c0_i32, %c0_i32_0 : i32, i32, i32
  }
  func.func @transform_1(%arg0: i32, %arg1: i32) -> (i32, i32) {
    %c0_i32 = arith.constant 0 : i32
    %c0_i32_0 = arith.constant 0 : i32
    %c0_i32_1 = arith.constant 0 : i32
    return %c0_i32, %c0_i32_0 : i32, i32
  }
  func.func @transform_2(%arg0: i32, %arg1: i32) -> (i32, i32) {
    %c0_i32 = arith.constant 0 : i32
    %c0_i32_0 = arith.constant 0 : i32
    %c0_i32_1 = arith.constant 0 : i32
    return %c0_i32, %c0_i32_0 : i32, i32
  }
  func.func @transform_3(%arg0: i32, %arg1: i32) -> (i32, i32, i32) {
    %c0_i32 = arith.constant 0 : i32
    %c0_i32_0 = arith.constant 0 : i32
    return %arg0, %c0_i32, %arg1 : i32, i32, i32
  }
}

module attributes {stable_mosaic.version = 11 : i64} {
  func.func @kernel(%arg0: i32, %arg1: i32, %arg2: memref<1x32x130xbf16, #tpu.memory_space<vmem>>, %arg3: memref<32x80xbf16, #tpu.memory_space<vmem>>, %arg4: memref<32x1xf32, #tpu.memory_space<vmem>>, %arg5: memref<1x32x128xbf16, #tpu.memory_space<vmem>>) attributes {dimension_semantics = [#tpu.dimension_semantics<parallel>, #tpu.dimension_semantics<parallel>], iteration_bounds = array<i64: 2, 1>, scalar_prefetch = 0 : i64, scratch_operands = 0 : i64, tpu.core_type = #tpu.core_type<tc>, window_params = [{transform_indices = @transform_0, window_bounds = array<i64: 1, 32, 130>}, {pipeline_mode = #tpu.pipeline_mode<synchronous>, transform_indices = @transform_1, window_bounds = array<i64: 32, 80>}, {pipeline_mode = #tpu.pipeline_mode<synchronous>, transform_indices = @transform_2, window_bounds = array<i64: 32, 1>}, {transform_indices = @transform_3, window_bounds = array<i64: 1, 32, 128>}]} {
    %c128_i32 = arith.constant 128 : i32
    %0 = arith.muli %arg1, %c128_i32 : i32
    %1 = tpu.assume_multiple %0, 128 : i32
    %c0 = arith.constant 0 : index
    %c0_0 = arith.constant 0 : index
    %2 = arith.index_cast %1 : i32 to index
    %3 = vector.load %arg2[%c0, %c0_0, %2] : memref<1x32x130xbf16, #tpu.memory_space<vmem>>, vector<1x16x130xbf16>
    %4 = vector.shape_cast %3 : vector<1x16x130xbf16> to vector<16x130xbf16>
    %c0_1 = arith.constant 0 : index
    %c16 = arith.constant 16 : index
    %5 = arith.index_cast %1 : i32 to index
    %6 = vector.load %arg2[%c0_1, %c16, %5] : memref<1x32x130xbf16, #tpu.memory_space<vmem>>, vector<1x16x129xbf16>
    %7 = vector.shape_cast %6 : vector<1x16x129xbf16> to vector<16x129xbf16>
    %8 = vector.extract_strided_slice %4 {offsets = [0, 0], sizes = [16, 128], strides = [1, 1]} : vector<16x130xbf16> to vector<16x128xbf16>
    %9 = vector.extract_strided_slice %7 {offsets = [0, 0], sizes = [16, 128], strides = [1, 1]} : vector<16x129xbf16> to vector<16x128xbf16>
    %10 = vector.extract_strided_slice %4 {offsets = [0, 1], sizes = [16, 128], strides = [1, 1]} : vector<16x130xbf16> to vector<16x128xbf16>
    %11 = vector.extract_strided_slice %7 {offsets = [0, 1], sizes = [16, 128], strides = [1, 1]} : vector<16x129xbf16> to vector<16x128xbf16>
    %12 = vector.extract_strided_slice %4 {offsets = [0, 2], sizes = [16, 128], strides = [1, 1]} : vector<16x130xbf16> to vector<16x128xbf16>
    %13 = tpu.concatenate %8, %9, %10, %11, %12 in 0 : vector<16x128xbf16>, vector<16x128xbf16>, vector<16x128xbf16>, vector<16x128xbf16>, vector<16x128xbf16> -> vector<80x128xbf16>
    %c0_2 = arith.constant 0 : index
    %c0_3 = arith.constant 0 : index
    %14 = vector.load %arg3[%c0_2, %c0_3] : memref<32x80xbf16, #tpu.memory_space<vmem>>, vector<32x80xbf16>
    %cst = arith.constant dense<0.000000e+00> : vector<32x128xf32>
    %15 = tpu.matmul %14, %13, %cst {dimension_numbers = #tpu.dot_dimension_numbers<[1], [0], [0], [1], [0, 0, 1, 1], [], []>} : vector<32x80xbf16>, vector<80x128xbf16>, vector<32x128xf32> -> vector<32x128xf32>
    %c0_4 = arith.constant 0 : index
    %c0_5 = arith.constant 0 : index
    %16 = vector.load %arg4[%c0_4, %c0_5] : memref<32x1xf32, #tpu.memory_space<vmem>>, vector<32x1xf32>
    %17 = vector.broadcast %16 : vector<32x1xf32> to vector<32x128xf32>
    %18 = arith.addf %15, %17 : vector<32x128xf32>
    %cst_6 = arith.constant 1.000000e-01 : f32
    %19 = vector.broadcast %cst_6 : f32 to vector<32x128xf32>
    %20 = arith.mulf %19, %18 : vector<32x128xf32>
    %21 = arith.maximumf %18, %20 : vector<32x128xf32>
    %22 = arith.truncf %21 : vector<32x128xf32> to vector<32x128xbf16>
    %c0_7 = arith.constant 0 : index
    %c0_8 = arith.constant 0 : index
    %c0_9 = arith.constant 0 : index
    %23 = vector.load %arg5[%c0_7, %c0_8, %c0_9] : memref<1x32x128xbf16, #tpu.memory_space<vmem>>, vector<1x32x128xbf16>
    %24 = vector.shape_cast %23 : vector<1x32x128xbf16> to vector<32x128xbf16>
    %25 = vector.shape_cast %22 : vector<32x128xbf16> to vector<1x32x128xbf16>
    tpu.vector_store %arg5[%c0_7, %c0_8, %c0_9], %25 {strides = array<i32>} : memref<1x32x128xbf16, #tpu.memory_space<vmem>>, vector<1x32x128xbf16>,
    return
  }
  func.func @transform_0(%arg0: i32, %arg1: i32) -> (i32, i32, i32) {
    %c0_i32 = arith.constant 0 : i32
    %c0_i32_0 = arith.constant 0 : i32
    %c0_i32_1 = arith.constant 0 : i32
    return %arg0, %c0_i32, %c0_i32_0 : i32, i32, i32
  }
  func.func @transform_1(%arg0: i32, %arg1: i32) -> (i32, i32) {
    %c0_i32 = arith.constant 0 : i32
    %c0_i32_0 = arith.constant 0 : i32
    %c0_i32_1 = arith.constant 0 : i32
    return %c0_i32, %c0_i32_0 : i32, i32
  }
  func.func @transform_2(%arg0: i32, %arg1: i32) -> (i32, i32) {
    %c0_i32 = arith.constant 0 : i32
    %c0_i32_0 = arith.constant 0 : i32
    %c0_i32_1 = arith.constant 0 : i32
    return %c0_i32, %c0_i32_0 : i32, i32
  }
  func.func @transform_3(%arg0: i32, %arg1: i32) -> (i32, i32, i32) {
    %c0_i32 = arith.constant 0 : i32
    %c0_i32_0 = arith.constant 0 : i32
    return %arg0, %c0_i32, %arg1 : i32, i32, i32
  }
}

module attributes {stable_mosaic.version = 11 : i64} {
  func.func @kernel(%arg0: i32, %arg1: i32, %arg2: memref<1x32x130xbf16, #tpu.memory_space<vmem>>, %arg3: memref<64x96xbf16, #tpu.memory_space<vmem>>, %arg4: memref<64x1xf32, #tpu.memory_space<vmem>>, %arg5: memref<1x64x128xbf16, #tpu.memory_space<vmem>>) attributes {dimension_semantics = [#tpu.dimension_semantics<parallel>, #tpu.dimension_semantics<parallel>], iteration_bounds = array<i64: 2, 1>, scalar_prefetch = 0 : i64, scratch_operands = 0 : i64, tpu.core_type = #tpu.core_type<tc>, window_params = [{transform_indices = @transform_0, window_bounds = array<i64: 1, 32, 130>}, {pipeline_mode = #tpu.pipeline_mode<synchronous>, transform_indices = @transform_1, window_bounds = array<i64: 64, 96>}, {pipeline_mode = #tpu.pipeline_mode<synchronous>, transform_indices = @transform_2, window_bounds = array<i64: 64, 1>}, {transform_indices = @transform_3, window_bounds = array<i64: 1, 64, 128>}]} {
    %c128_i32 = arith.constant 128 : i32
    %0 = arith.muli %arg1, %c128_i32 : i32
    %1 = tpu.assume_multiple %0, 128 : i32
    %c0 = arith.constant 0 : index
    %c0_0 = arith.constant 0 : index
    %2 = arith.index_cast %1 : i32 to index
    %3 = vector.load %arg2[%c0, %c0_0, %2] : memref<1x32x130xbf16, #tpu.memory_space<vmem>>, vector<1x32x130xbf16>
    %4 = vector.shape_cast %3 : vector<1x32x130xbf16> to vector<32x130xbf16>
    %5 = vector.extract_strided_slice %4 {offsets = [0, 0], sizes = [32, 128], strides = [1, 1]} : vector<32x130xbf16> to vector<32x128xbf16>
    %6 = vector.extract_strided_slice %4 {offsets = [0, 1], sizes = [32, 128], strides = [1, 1]} : vector<32x130xbf16> to vector<32x128xbf16>
    %7 = vector.extract_strided_slice %4 {offsets = [0, 2], sizes = [32, 128], strides = [1, 1]} : vector<32x130xbf16> to vector<32x128xbf16>
    %8 = tpu.concatenate %5, %6, %7 in 0 : vector<32x128xbf16>, vector<32x128xbf16>, vector<32x128xbf16> -> vector<96x128xbf16>
    %c0_1 = arith.constant 0 : index
    %c0_2 = arith.constant 0 : index
    %9 = vector.load %arg3[%c0_1, %c0_2] : memref<64x96xbf16, #tpu.memory_space<vmem>>, vector<64x96xbf16>
    %cst = arith.constant dense<0.000000e+00> : vector<64x128xf32>
    %10 = tpu.matmul %9, %8, %cst {dimension_numbers = #tpu.dot_dimension_numbers<[1], [0], [0], [1], [0, 0, 1, 1], [], []>} : vector<64x96xbf16>, vector<96x128xbf16>, vector<64x128xf32> -> vector<64x128xf32>
    %c0_3 = arith.constant 0 : index
    %c0_4 = arith.constant 0 : index
    %11 = vector.load %arg4[%c0_3, %c0_4] : memref<64x1xf32, #tpu.memory_space<vmem>>, vector<64x1xf32>
    %12 = vector.broadcast %11 : vector<64x1xf32> to vector<64x128xf32>
    %13 = arith.addf %10, %12 : vector<64x128xf32>
    %cst_5 = arith.constant 1.000000e-01 : f32
    %14 = vector.broadcast %cst_5 : f32 to vector<64x128xf32>
    %15 = arith.mulf %14, %13 : vector<64x128xf32>
    %16 = arith.maximumf %13, %15 : vector<64x128xf32>
    %17 = arith.truncf %16 : vector<64x128xf32> to vector<64x128xbf16>
    %c0_6 = arith.constant 0 : index
    %c0_7 = arith.constant 0 : index
    %c0_8 = arith.constant 0 : index
    %18 = vector.load %arg5[%c0_6, %c0_7, %c0_8] : memref<1x64x128xbf16, #tpu.memory_space<vmem>>, vector<1x64x128xbf16>
    %19 = vector.shape_cast %18 : vector<1x64x128xbf16> to vector<64x128xbf16>
    %20 = vector.shape_cast %17 : vector<64x128xbf16> to vector<1x64x128xbf16>
    tpu.vector_store %arg5[%c0_6, %c0_7, %c0_8], %20 {strides = array<i32>} : memref<1x64x128xbf16, #tpu.memory_space<vmem>>, vector<1x64x128xbf16>,
    return
  }
  func.func @transform_0(%arg0: i32, %arg1: i32) -> (i32, i32, i32) {
    %c0_i32 = arith.constant 0 : i32
    %c0_i32_0 = arith.constant 0 : i32
    %c0_i32_1 = arith.constant 0 : i32
    return %arg0, %c0_i32, %c0_i32_0 : i32, i32, i32
  }
  func.func @transform_1(%arg0: i32, %arg1: i32) -> (i32, i32) {
    %c0_i32 = arith.constant 0 : i32
    %c0_i32_0 = arith.constant 0 : i32
    %c0_i32_1 = arith.constant 0 : i32
    return %c0_i32, %c0_i32_0 : i32, i32
  }
  func.func @transform_2(%arg0: i32, %arg1: i32) -> (i32, i32) {
    %c0_i32 = arith.constant 0 : i32
    %c0_i32_0 = arith.constant 0 : i32
    %c0_i32_1 = arith.constant 0 : i32
    return %c0_i32, %c0_i32_0 : i32, i32
  }
  func.func @transform_3(%arg0: i32, %arg1: i32) -> (i32, i32, i32) {
    %c0_i32 = arith.constant 0 : i32
    %c0_i32_0 = arith.constant 0 : i32
    return %arg0, %c0_i32, %arg1 : i32, i32, i32
  }
}

module attributes {stable_mosaic.version = 11 : i64} {
  func.func @kernel(%arg0: i32, %arg1: i32, %arg2: memref<1x64x130xbf16, #tpu.memory_space<vmem>>, %arg3: memref<128x192xbf16, #tpu.memory_space<vmem>>, %arg4: memref<128x1xf32, #tpu.memory_space<vmem>>, %arg5: memref<1x128x128xf32, #tpu.memory_space<vmem>>) attributes {dimension_semantics = [#tpu.dimension_semantics<parallel>, #tpu.dimension_semantics<parallel>], iteration_bounds = array<i64: 2, 1>, scalar_prefetch = 0 : i64, scratch_operands = 0 : i64, tpu.core_type = #tpu.core_type<tc>, window_params = [{transform_indices = @transform_0, window_bounds = array<i64: 1, 64, 130>}, {pipeline_mode = #tpu.pipeline_mode<synchronous>, transform_indices = @transform_1, window_bounds = array<i64: 128, 192>}, {pipeline_mode = #tpu.pipeline_mode<synchronous>, transform_indices = @transform_2, window_bounds = array<i64: 128, 1>}, {transform_indices = @transform_3, window_bounds = array<i64: 1, 128, 128>}]} {
    %c128_i32 = arith.constant 128 : i32
    %0 = arith.muli %arg1, %c128_i32 : i32
    %1 = tpu.assume_multiple %0, 128 : i32
    %c0 = arith.constant 0 : index
    %c0_0 = arith.constant 0 : index
    %2 = arith.index_cast %1 : i32 to index
    %3 = vector.load %arg2[%c0, %c0_0, %2] : memref<1x64x130xbf16, #tpu.memory_space<vmem>>, vector<1x64x130xbf16>
    %4 = vector.shape_cast %3 : vector<1x64x130xbf16> to vector<64x130xbf16>
    %5 = vector.extract_strided_slice %4 {offsets = [0, 0], sizes = [64, 128], strides = [1, 1]} : vector<64x130xbf16> to vector<64x128xbf16>
    %6 = vector.extract_strided_slice %4 {offsets = [0, 1], sizes = [64, 128], strides = [1, 1]} : vector<64x130xbf16> to vector<64x128xbf16>
    %7 = vector.extract_strided_slice %4 {offsets = [0, 2], sizes = [64, 128], strides = [1, 1]} : vector<64x130xbf16> to vector<64x128xbf16>
    %8 = tpu.concatenate %5, %6, %7 in 0 : vector<64x128xbf16>, vector<64x128xbf16>, vector<64x128xbf16> -> vector<192x128xbf16>
    %c0_1 = arith.constant 0 : index
    %c0_2 = arith.constant 0 : index
    %9 = vector.load %arg3[%c0_1, %c0_2] : memref<128x192xbf16, #tpu.memory_space<vmem>>, vector<128x192xbf16>
    %cst = arith.constant dense<0.000000e+00> : vector<128x128xf32>
    %10 = tpu.matmul %9, %8, %cst {dimension_numbers = #tpu.dot_dimension_numbers<[1], [0], [0], [1], [0, 0, 1, 1], [], []>} : vector<128x192xbf16>, vector<192x128xbf16>, vector<128x128xf32> -> vector<128x128xf32>
    %c0_3 = arith.constant 0 : index
    %c0_4 = arith.constant 0 : index
    %11 = vector.load %arg4[%c0_3, %c0_4] : memref<128x1xf32, #tpu.memory_space<vmem>>, vector<128x1xf32>
    %12 = vector.broadcast %11 : vector<128x1xf32> to vector<128x128xf32>
    %13 = arith.addf %10, %12 : vector<128x128xf32>
    %cst_5 = arith.constant 1.000000e-01 : f32
    %14 = vector.broadcast %cst_5 : f32 to vector<128x128xf32>
    %15 = arith.mulf %14, %13 : vector<128x128xf32>
    %16 = arith.maximumf %13, %15 : vector<128x128xf32>
    %c0_6 = arith.constant 0 : index
    %c0_7 = arith.constant 0 : index
    %c0_8 = arith.constant 0 : index
    %17 = vector.load %arg5[%c0_6, %c0_7, %c0_8] : memref<1x128x128xf32, #tpu.memory_space<vmem>>, vector<1x128x128xf32>
    %18 = vector.shape_cast %17 : vector<1x128x128xf32> to vector<128x128xf32>
    %19 = vector.shape_cast %16 : vector<128x128xf32> to vector<1x128x128xf32>
    tpu.vector_store %arg5[%c0_6, %c0_7, %c0_8], %19 {strides = array<i32>} : memref<1x128x128xf32, #tpu.memory_space<vmem>>, vector<1x128x128xf32>,
    return
  }
  func.func @transform_0(%arg0: i32, %arg1: i32) -> (i32, i32, i32) {
    %c0_i32 = arith.constant 0 : i32
    %c0_i32_0 = arith.constant 0 : i32
    %c0_i32_1 = arith.constant 0 : i32
    return %arg0, %c0_i32, %c0_i32_0 : i32, i32, i32
  }
  func.func @transform_1(%arg0: i32, %arg1: i32) -> (i32, i32) {
    %c0_i32 = arith.constant 0 : i32
    %c0_i32_0 = arith.constant 0 : i32
    %c0_i32_1 = arith.constant 0 : i32
    return %c0_i32, %c0_i32_0 : i32, i32
  }
  func.func @transform_2(%arg0: i32, %arg1: i32) -> (i32, i32) {
    %c0_i32 = arith.constant 0 : i32
    %c0_i32_0 = arith.constant 0 : i32
    %c0_i32_1 = arith.constant 0 : i32
    return %c0_i32, %c0_i32_0 : i32, i32
  }
  func.func @transform_3(%arg0: i32, %arg1: i32) -> (i32, i32, i32) {
    %c0_i32 = arith.constant 0 : i32
    %c0_i32_0 = arith.constant 0 : i32
    return %arg0, %c0_i32, %arg1 : i32, i32, i32
  }
}

</mosaic_0001>

<bundles_post_ra>
// kernel: _forward_impl.4
= control target key start
LH: loop header
LB: loop body
LE: loop exit
PB: predicated region body
PF: predicated region fallthrough
CT: control target
= control target key end

     0   :  { %s566_s12 = smov 0   ;;  %s568_s13 = smov 0   ;;  %s617_s0 = inlined_call_operand.vmem [shape: f32[2,2,131], index: 0, kind: input, shape index: {}]   ;;  %s618_s1 = inlined_call_operand.vmem [shape: f32[16,8], index: 1, kind: input, shape index: {}]   ;;  %s619_s2 = inlined_call_operand.vmem [shape: f32[16,1], index: 2, kind: input, shape index: {}]   ;;  %s620_s3 = inlined_call_operand.vmem [shape: bf16[2,16,128], index: 3, kind: output, shape index: {}]  }
   0x1   :  { %s570_s14 = smov 0  }
   0x2 LB: > { %s25_s15 = sadd.s32 1, %s536_s13  ;;  %p458_p0 = scmp.ge.s32.totalorder %s540_s14, 1  ;;  %s540_s14 = sphi %s570_s14, %s13_s14   ;;  %s536_s13 = sphi %s568_s13, %s622_s13   ;;  %s532_s12 = sphi %s566_s12, %s621_s12  }
   0x3   : > { %p27_p1 = scmp.ge.s32.totalorder %s25_s15, 2  ;;  %p151_p2 = scmp.lt.s32.totalorder %s540_s14, 3 }
   0x5   : > { %s624_s15 = smov (%p27_p1, %s25_s15), 0  ;;  %p152_p3 = pnand %p458_p0, %p151_p2 }
   0x6   : > { %p178_p4 = scmp.lt.s32.totalorder (!%p152_p3), %s532_s12, 1  ;;  %v200_v0 = vlaneseq (!%p152_p3)  ;;  %vm251_vm0 = vcmask (!%p152_p3), 1040384   ;;  %s542_s20 = smov (!%p152_p3), 127   ;;  %v265_v11 = vld [vmem:[%s618_s1] sm:$0xff] (!%p152_p3)  ;;  %vm279_vm1 = vcmask (!%p152_p3), 64512   ;;  %v544_v12 = vmov (!%p152_p3), 0  }
   0x7   : > { %155 = sbr.rel (%p152_p3) target bundleno = 377 (0x179), region = 32  ;;  %485 = vmatprep.mubr.msk.f32.mxu0 (!%p152_p3), %vm279_vm1, %v265_v11  ;;  %s543_s23 = smov (!%p152_p3), 126   ;;  %517 = vset.pattern.permute.xlu1 (!%p152_p3), %v544_v12  ;;  %v268_v13 = vld [vmem:[%s619_s2 + $0x8] sm:$0xff] (!%p152_p3)  ;;  %v267_v14 = vld [vmem:[%s619_s2] sm:$0xff] (!%p152_p3)  ;;  %vm218_vm2 = vcmask (!%p152_p3), 1039360   ;;  %vm253_vm3 = vcmask (!%p152_p3), 1041408  }
   0x8   : > { %v201_v1 = vshrl.u32 (!%p152_p3), %v200_v0, 7  ;;  %516 = vset.pattern.permute.xlu0 (!%p152_p3), %v544_v12  ;;  %s545_s24 = smov (!%p152_p3), 125   ;;  %vm235_vm4 = vcmask (!%p152_p3), 1031168   ;;  %vm255_vm5 = vcmask (!%p152_p3), 1042432   ;;  %vm257_vm6 = vcmask (!%p152_p3), 1043456   ;;  %v266_v35 = vld [vmem:[%s618_s1 + $0x8] sm:$0xff] (!%p152_p3) }
   0x9   : > { %vm248_vm7 = vcmask (!%p152_p3), 1022976   ;;  %vm259_vm8 = vcmask (!%p152_p3), 1044480   ;;  %vm261_vm9 = vcmask (!%p152_p3), 1045504   ;;  %vm263_vm10 = vcmask (!%p152_p3), 1046528  }
   0xa   : > { %v202_v2 = vsub.s32 (!%p152_p3), 0, %v201_v1  ;;  %v212_v3 = vsub.s32 (!%p152_p3), 1, %v201_v1 }
   0xe   : > { %s626_s12 = smov (!%p178_p4, %s532_s12), 1 }
   0xf   : > { %s471_s16 = sshll.u32 %s626_s12, 2  ;;  %s472_s4 = sshll.u32 %s626_s12, 3 }
  0x10   : > { %s182_s19 = scalar_lea.vmem %s617_s0, %s471_s16  ;;  %s190_s7 = scalar_lea.vmem %s620_s3, %s472_s4 }
  0x11   : > { %v463_v4 = vld [vmem:[%s182_s19 + $0x1] ss:$2 sm:$0x3]  ;;  %v196_v5 = vld [vmem:[%s182_s19] ss:$2 sm:$0x3] }
  0x12   : > { %v203_v6 = vrot.slane %v463_v4, %v202_v2  ;;  %v209_v7 = vrot.slane %v196_v5, %v202_v2  ;;  %v224_v8 = vrot.slane %v463_v4, %v212_v3  ;;  %v213_v9 = vrot.slane %v196_v5, %v212_v3 }
  0x14   : > { %225 = vrot.lane.b32.xlu1 %v203_v6, %s542_s20  ;;  %214 = vrot.lane.b32.xlu0 %v209_v7, %s542_s20  ;;  %v252_v10 = vsel %vm251_vm0, %v196_v5, %v203_v6 }
  0x18   : > { %227 = vrot.lane.b32.xlu1 %v224_v8, %s542_s20  ;;  %216 = vrot.lane.b32.xlu0 %v213_v9, %s542_s20 }
  0x1c   : > { %233 = vrot.lane.b32.xlu1 %v213_v9, %s543_s23  ;;  %231 = vrot.lane.b32.xlu0 %v209_v7, %s543_s23 }
  0x20   : > { %240 = vrot.lane.b32.xlu1 %v224_v8, %s543_s23  ;;  %238 = vrot.lane.b32.xlu0 %v203_v6, %s543_s23 }
  0x24   : > { %246 = vrot.lane.b32.xlu1 %v213_v9, %s545_s24  ;;  %244 = vrot.lane.b32.xlu0 %v209_v7, %s545_s24 }
  0x28   : > { %276 = vperm.xlu1 %517, %v268_v13   ;;  %271 = vperm.xlu0 %516, %v267_v14  }
  0x86   : > { %v226_v15 = vpop.permute.xlu1 %225  ;;  %v215_v16 = vpop.permute.xlu0 %214 }
  0x8a   : > { %v228_v17 = vpop.permute.xlu1 %227  ;;  %v217_v18 = vpop.permute.xlu0 %216 }
  0x8b   : > { %v219_v21 = vsel %vm218_vm2, %v215_v16, %v217_v18  ;;  %v229_v22 = vsel %vm218_vm2, %v226_v15, %v228_v17 }
  0x8c   : > { %v254_v23 = vsel %vm253_vm3, %v252_v10, %v219_v21 }
  0x8d   : > { %v256_v28 = vsel %vm255_vm5, %v254_v23, %v229_v22 }
  0x8e   : > { %v234_v19 = vpop.permute.xlu1 %233  ;;  %v232_v20 = vpop.permute.xlu0 %231 }
  0x8f   : > { %v236_v26 = vsel %vm235_vm4, %v232_v20, %v234_v19 }
  0x90   : > { %v258_v29 = vsel %vm257_vm6, %v256_v28, %v236_v26 }
  0x92   : > { %v241_v24 = vpop.permute.xlu1 %240  ;;  %v239_v25 = vpop.permute.xlu0 %238 }
  0x93   : > { %v242_v27 = vsel %vm235_vm4, %v239_v25, %v241_v24 }
  0x94   : > { %v260_v33 = vsel %vm259_vm8, %v258_v29, %v242_v27 }
  0x96   : > { %v247_v30 = vpop.permute.xlu1 %246  ;;  %v245_v31 = vpop.permute.xlu0 %244 }
  0x97   : > { %v249_v32 = vsel %vm248_vm7, %v245_v31, %v247_v30 }
  0x98   : > { %v262_v34 = vsel %vm261_vm9, %v260_v33, %v249_v32 }
  0x99   : > { %483 = vmatprep.subr.msk.mxu0 %vm263_vm10, %v262_v34 }
  0x9a   : > { %484 = vmatpush3.msk.msra.mxu0 %vm263_vm10, %v262_v34 }
  0x9b   : > { %486 = vmatmul.mubr.msk.f32.vlgmr.msra.gmra.mrb[0].mxu0 %vm279_vm1, %v266_v35 }
  0xa7   : > { %v277_v36 = vpop.permute.xlu1 %276  ;;  %v272_v37 = vpop.permute.xlu0 %271 }
 0x16e   : > { %v487_v38 = vpop.f32.mrb[0].mxu0 }
 0x16f   : > { %v358_v39 = vadd.f32 %v487_v38, %v277_v36  ;;  %v352_v40 = vpop.f32.mrb[1].mxu0 }
 0x170   : > { %v353_v41 = vadd.f32 %v352_v40, %v272_v37 }
 0x171   : > { %v362_v42 = vmul.f32 0.1, %v358_v39 }
 0x172   : > { %v361_v43 = vmul.f32 0.1, %v353_v41 }
 0x173   : > { %v364_v44 = vmax.f32 %v358_v39, %v362_v42 }
 0x174   : > { %v363_v45 = vmax.f32 %v353_v41, %v361_v43 }
 0x176   : > { %v478_v46 = vpack.c.bf16 %v364_v44, %v363_v45 }
 0x178   : > { %479 = vst [vmem:[%s190_s7] sm:$0xff] %v478_v46  }
 0x179 PF: > { %s13_s14 = sadd.s32 1, %s540_s14   ;;  %s621_s12 = smov %s536_s13 }
 0x17a   : > { %p10_p5 = scmp.ge.s32.totalorder %s13_s14, 4   ;;  %s622_s13 = smov %s624_s15 }
 0x17c   :  { %12 = sbr.rel (!%p10_p5) target bundleno = 2 (0x2), region = 64 }

// kernel: _forward_impl.6
= control target key start
LH: loop header
LB: loop body
LE: loop exit
PB: predicated region body
PF: predicated region fallthrough
CT: control target
= control target key end

     0   :  { %s726_s12 = smov 0   ;;  %s728_s13 = smov 0   ;;  %s806_s0 = inlined_call_operand.vmem [shape: bf16[2,32,130], index: 0, kind: input, shape index: {}]   ;;  %s807_s1 = inlined_call_operand.vmem [shape: bf16[64,96], index: 1, kind: input, shape index: {}]   ;;  %s808_s2 = inlined_call_operand.vmem [shape: f32[64,1], index: 2, kind: input, shape index: {}]   ;;  %s809_s3 = inlined_call_operand.vmem [shape: bf16[2,64,128], index: 3, kind: output, shape index: {}]  }
   0x1   :  { %s730_s14 = smov 0  }
   0x2 LB: > { %s25_s15 = sadd.s32 1, %s697_s13  ;;  %p538_p0 = scmp.ge.s32.totalorder %s701_s14, 1  ;;  %s701_s14 = sphi %s730_s14, %s13_s14   ;;  %s697_s13 = sphi %s728_s13, %s811_s13   ;;  %s693_s12 = sphi %s726_s12, %s810_s12  }
   0x3   : > { %p27_p1 = scmp.ge.s32.totalorder %s25_s15, 2  ;;  %p151_p2 = scmp.lt.s32.totalorder %s701_s14, 3 }
   0x5   : > { %s813_s15 = smov (%p27_p1, %s25_s15), 0  ;;  %p152_p3 = pnand %p538_p0, %p151_p2 }
   0x6   : > { %p178_p4 = scmp.lt.s32.totalorder (!%p152_p3), %s693_s12, 1  ;;  %s703_s20 = smov (!%p152_p3), 127   ;;  %v675_v4 = vld [vmem:[%s807_s1] sm:$0xff] (!%p152_p3)   ;;  %vm321_vm0 = vcmask (!%p152_p3), 785408   ;;  %v676_v5 = vld [vmem:[%s807_s1 + $0x10] sm:$0xff] (!%p152_p3)   ;;  %v705_v6 = vmov (!%p152_p3), 0  }
   0x7   : > { %155 = sbr.rel (%p152_p3) target bundleno = 378 (0x17a), region = 32  ;;  %s704_s25 = smov (!%p152_p3), 126   ;;  %620 = vmatprep.mubr.msk.bf16.mxu0 (!%p152_p3), %vm321_vm0, %v675_v4  ;;  %624 = vmatprep.mubr.msk.bf16.mxu1 (!%p152_p3), %vm321_vm0, %v676_v5  ;;  %v254_v7 = vld [vmem:[%s808_s2 + $0x8] sm:$0xff] (!%p152_p3)  ;;  %v253_v8 = vld [vmem:[%s808_s2] sm:$0xff] (!%p152_p3)  ;;  %v255_v9 = vld [vmem:[%s808_s2 + $0x10] sm:$0xff] (!%p152_p3)  ;;  %vm227_vm1 = vcmask (!%p152_p3), 1039360  }
   0x8   : > { %668 = vset.pattern.permute.xlu1 (!%p152_p3), %v705_v6  ;;  %667 = vset.pattern.permute.xlu0 (!%p152_p3), %v705_v6  ;;  %v256_v10 = vld [vmem:[%s808_s2 + $0x18] sm:$0xff] (!%p152_p3)  ;;  %v257_v11 = vld [vmem:[%s808_s2 + $0x20] sm:$0xff] (!%p152_p3)  ;;  %v258_v12 = vld [vmem:[%s808_s2 + $0x28] sm:$0xff] (!%p152_p3)  ;;  %vm240_vm2 = vcmask (!%p152_p3), 1031168  }
   0x9   : > { %v259_v13 = vld [vmem:[%s808_s2 + $0x30] sm:$0xff] (!%p152_p3)  ;;  %v260_v14 = vld [vmem:[%s808_s2 + $0x38] sm:$0xff] (!%p152_p3)  ;;  %v677_v27 = vld [vmem:[%s807_s1 + $0x8] sm:$0xff] (!%p152_p3)  }
   0xa   : > { %v678_v28 = vld [vmem:[%s807_s1 + $0x18] sm:$0xff] (!%p152_p3)  }
   0xe   : > { %s815_s12 = smov (!%p178_p4, %s693_s12), 1 }
   0xf   : > { %s565_s16 = sshll.u32 %s815_s12, 5 }
  0x10   : > { %s182_s19 = scalar_lea.vmem %s806_s0, %s565_s16  ;;  %s190_s26 = scalar_lea.vmem %s809_s3, %s565_s16 }
  0x11   : > { %v669_v0 = vld [vmem:[%s182_s19 + $0x10] ss:$8 sps:$4 sm:$0xff]   ;;  %v671_v1 = vld [vmem:[%s182_s19] ss:$8 sps:$4 sm:$0xff]   ;;  %v673_v2 = vld [vmem:[%s182_s19 + $0x14] ss:$8 sps:$4 sm:$0xff]  }
  0x12   : > { %223 = vrot.lane.b32.xlu1 %v669_v0, %s703_s20  ;;  %219 = vrot.lane.b32.xlu0 %v671_v1, %s703_s20  ;;  %v674_v3 = vld [vmem:[%s182_s19 + $0x4] ss:$8 sps:$4 sm:$0xff]  }
  0x13   : > { %608 = vmatprep.subr.bf16.mxu0 %v671_v1  ;;  %628 = vmatprep.subr.bf16.mxu1 %v671_v1 }
  0x14   : > { %609 = vmatpush3.bf16.msra.mxu0 %v671_v1  ;;  %634 = vmatpush3.bf16.msra.mxu1 %v671_v1 }
  0x15   : > { %610 = vmatprep.subr.bf16.mxu0 %v669_v0  ;;  %629 = vmatprep.subr.bf16.mxu1 %v669_v0 }
  0x16   : > { %225 = vrot.lane.b32.xlu1 %v673_v2, %s703_s20  ;;  %221 = vrot.lane.b32.xlu0 %v674_v3, %s703_s20 }
  0x18   : > { %611 = vmatpush3.bf16.msra.mxu0 %v669_v0  ;;  %635 = vmatpush3.bf16.msra.mxu1 %v669_v0 }
  0x1a   : > { %234 = vrot.lane.b32.xlu1 %v674_v3, %s704_s25  ;;  %232 = vrot.lane.b32.xlu0 %v671_v1, %s704_s25 }
  0x1e   : > { %238 = vrot.lane.b32.xlu1 %v673_v2, %s704_s25  ;;  %236 = vrot.lane.b32.xlu0 %v669_v0, %s704_s25 }
  0x22   : > { %268 = vperm.xlu1 %668, %v254_v7   ;;  %263 = vperm.xlu0 %667, %v253_v8  }
  0x26   : > { %273 = vperm.xlu1 %668, %v255_v9   ;;  %278 = vperm.xlu0 %667, %v256_v10  }
  0x2a   : > { %283 = vperm.xlu1 %668, %v257_v11   ;;  %288 = vperm.xlu0 %667, %v258_v12  }
  0x2e   : > { %293 = vperm.xlu1 %668, %v259_v13   ;;  %298 = vperm.xlu0 %667, %v260_v14  }
  0x84   : > { %v224_v15 = vpop.permute.xlu1 %223  ;;  %v220_v16 = vpop.permute.xlu0 %219 }
  0x88   : > { %v226_v17 = vpop.permute.xlu1 %225  ;;  %v222_v18 = vpop.permute.xlu0 %221 }
  0x89   : > { %v228_v19 = vsel %vm227_vm1, %v220_v16, %v222_v18  ;;  %v229_v20 = vsel %vm227_vm1, %v224_v15, %v226_v17 }
  0x8a   : > { %612 = vmatprep.subr.bf16.mxu0 %v228_v19  ;;  %630 = vmatprep.subr.bf16.mxu1 %v228_v19 }
  0x8b   : > { %613 = vmatpush3.bf16.msra.mxu0 %v228_v19  ;;  %636 = vmatpush3.bf16.msra.mxu1 %v228_v19 }
  0x8c   : > { %v235_v21 = vpop.permute.xlu1 %234  ;;  %614 = vmatprep.subr.bf16.mxu0 %v229_v20  ;;  %631 = vmatprep.subr.bf16.mxu1 %v229_v20  ;;  %v233_v22 = vpop.permute.xlu0 %232 }
  0x8d   : > { %v241_v23 = vsel %vm240_vm2, %v233_v22, %v235_v21 }
  0x8f   : > { %615 = vmatpush3.bf16.msra.mxu0 %v229_v20  ;;  %637 = vmatpush3.bf16.msra.mxu1 %v229_v20 }
  0x90   : > { %v239_v24 = vpop.permute.xlu1 %238  ;;  %616 = vmatprep.subr.bf16.mxu0 %v241_v23  ;;  %632 = vmatprep.subr.bf16.mxu1 %v241_v23  ;;  %v237_v25 = vpop.permute.xlu0 %236 }
  0x91   : > { %v242_v26 = vsel %vm240_vm2, %v237_v25, %v239_v24 }
  0x93   : > { %617 = vmatpush3.bf16.msra.mxu0 %v241_v23  ;;  %638 = vmatpush3.bf16.msra.mxu1 %v241_v23 }
  0x94   : > { %618 = vmatprep.subr.bf16.mxu0 %v242_v26  ;;  %633 = vmatprep.subr.bf16.mxu1 %v242_v26 }
  0x97   : > { %619 = vmatpush3.bf16.msra.mxu0 %v242_v26  ;;  %639 = vmatpush3.bf16.msra.mxu1 %v242_v26 }
  0x9a   : > { %621 = vmatmul.mubr.msk.bf16.vlgmr.msra.gmra.mrb[0].mxu0 %vm321_vm0, %v677_v27  ;;  %625 = vmatmul.mubr.msk.bf16.vlgmr.msra.gmra.mrb[0].mxu1 %vm321_vm0, %v678_v28 }
  0xa1   : > { %v269_v29 = vpop.permute.xlu1 %268  ;;  %v264_v30 = vpop.permute.xlu0 %263 }
  0xa5   : > { %v274_v31 = vpop.permute.xlu1 %273  ;;  %v279_v32 = vpop.permute.xlu0 %278 }
  0xa9   : > { %v284_v33 = vpop.permute.xlu1 %283  ;;  %v289_v34 = vpop.permute.xlu0 %288 }
  0xad   : > { %v294_v35 = vpop.permute.xlu1 %293  ;;  %v299_v36 = vpop.permute.xlu0 %298 }
 0x16d   : > { %v622_v37 = vpop.f32.mrb[0].mxu0  ;;  %v626_v38 = vpop.f32.mrb[0].mxu1 }
 0x16e   : > { %v377_v39 = vadd.f32 %v622_v37, %v274_v31  ;;  %v393_v40 = vadd.f32 %v626_v38, %v294_v35  ;;  %v368_v41 = vpop.f32.mrb[1].mxu0  ;;  %v384_v42 = vpop.f32.mrb[1].mxu1 }
 0x16f   : > { %v369_v43 = vadd.f32 %v368_v41, %v264_v30  ;;  %v385_v44 = vadd.f32 %v384_v42, %v284_v33  ;;  %v623_v45 = vpop.f32.mrb[2].mxu0  ;;  %v627_v46 = vpop.f32.mrb[2].mxu1 }
 0x170   : > { %v401_v47 = vmul.f32 0.1, %v377_v39  ;;  %v405_v48 = vmul.f32 0.1, %v393_v40  ;;  %v380_v49 = vadd.f32 %v623_v45, %v279_v32  ;;  %v396_v50 = vadd.f32 %v627_v46, %v299_v36  ;;  %v371_v51 = vpop.f32.mrb[3].mxu0  ;;  %v387_v52 = vpop.f32.mrb[3].mxu1 }
 0x171   : > { %v399_v53 = vmul.f32 0.1, %v369_v43  ;;  %v403_v54 = vmul.f32 0.1, %v385_v44  ;;  %v372_v55 = vadd.f32 %v371_v51, %v269_v29  ;;  %v388_v56 = vadd.f32 %v387_v52, %v289_v34 }
 0x172   : > { %v402_v57 = vmul.f32 0.1, %v380_v49  ;;  %v406_v58 = vmul.f32 0.1, %v396_v50  ;;  %v409_v61 = vmax.f32 %v377_v39, %v401_v47  ;;  %v413_v62 = vmax.f32 %v393_v40, %v405_v48 }
 0x173   : > { %v400_v59 = vmul.f32 0.1, %v372_v55  ;;  %v404_v60 = vmul.f32 0.1, %v388_v56  ;;  %v407_v1 = vmax.f32 %v369_v43, %v399_v53  ;;  %v411_v2 = vmax.f32 %v385_v44, %v403_v54 }
 0x174   : > { %v410_v63 = vmax.f32 %v380_v49, %v402_v57  ;;  %v414_v0 = vmax.f32 %v396_v50, %v406_v58 }
 0x175   : > { %v408_v3 = vmax.f32 %v372_v55, %v400_v59  ;;  %v412_v4 = vmax.f32 %v388_v56, %v404_v60 }
 0x176   : > { %v583_v5 = vpack.c.bf16 %v410_v63, %v409_v61  ;;  %v593_v6 = vpack.c.bf16 %v414_v0, %v413_v62 }
 0x177   : > { %v578_v7 = vpack.c.bf16 %v408_v3, %v407_v1  ;;  %v588_v8 = vpack.c.bf16 %v412_v4, %v411_v2 }
 0x178   : > { %595 = vst [vmem:[%s190_s26 + $0x8] sm:$0xff] %v583_v5   ;;  %597 = vst [vmem:[%s190_s26 + $0x18] sm:$0xff] %v593_v6  }
 0x179   : > { %579 = vst [vmem:[%s190_s26] sm:$0xff] %v578_v7   ;;  %596 = vst [vmem:[%s190_s26 + $0x10] sm:$0xff] %v588_v8  }
 0x17a PF: > { %s13_s14 = sadd.s32 1, %s701_s14   ;;  %s810_s12 = smov %s697_s13 }
 0x17b   : > { %p10_p5 = scmp.ge.s32.totalorder %s13_s14, 4   ;;  %s811_s13 = smov %s813_s15 }
 0x17d   :  { %12 = sbr.rel (!%p10_p5) target bundleno = 2 (0x2), region = 63 }

// kernel: _forward_impl.5
= control target key start
LH: loop header
LB: loop body
LE: loop exit
PB: predicated region body
PF: predicated region fallthrough
CT: control target
= control target key end

     0   :  { %s585_s12 = smov 0   ;;  %s587_s13 = smov 0   ;;  %s642_s0 = inlined_call_operand.vmem [shape: bf16[2,32,130], index: 0, kind: input, shape index: {}]   ;;  %s643_s1 = inlined_call_operand.vmem [shape: bf16[32,80], index: 1, kind: input, shape index: {}]   ;;  %s644_s2 = inlined_call_operand.vmem [shape: f32[32,1], index: 2, kind: input, shape index: {}]   ;;  %s645_s3 = inlined_call_operand.vmem [shape: bf16[2,32,128], index: 3, kind: output, shape index: {}]  }
   0x1   :  { %s589_s14 = smov 0  }
   0x2 LB: > { %s25_s15 = sadd.s32 1, %s556_s13  ;;  %p444_p0 = scmp.ge.s32.totalorder %s560_s14, 1  ;;  %s560_s14 = sphi %s589_s14, %s13_s14   ;;  %s556_s13 = sphi %s587_s13, %s647_s13   ;;  %s552_s12 = sphi %s585_s12, %s646_s12  }
   0x3   : > { %p27_p1 = scmp.ge.s32.totalorder %s25_s15, 2  ;;  %p151_p2 = scmp.lt.s32.totalorder %s560_s14, 3 }
   0x5   : > { %s649_s15 = smov (%p27_p1, %s25_s15), 0  ;;  %p152_p3 = pnand %p444_p0, %p151_p2 }
   0x6   : > { %p178_p4 = scmp.lt.s32.totalorder (!%p152_p3), %s552_s12, 1  ;;  %s562_s20 = smov (!%p152_p3), 127   ;;  %v536_v4 = vld [vmem:[%s643_s1] sm:$0xff] (!%p152_p3)   ;;  %vm277_vm0 = vcmask (!%p152_p3), 654336   ;;  %v563_v5 = vmov (!%p152_p3), 0   ;;  %v244_v6 = vld [vmem:[%s644_s2 + $0x8] sm:$0xff] (!%p152_p3) }
   0x7   : > { %155 = sbr.rel (%p152_p3) target bundleno = 374 (0x176), region = 32  ;;  %497 = vmatprep.mubr.msk.bf16.mxu0 (!%p152_p3), %vm277_vm0, %v536_v4  ;;  %529 = vset.pattern.permute.xlu1 (!%p152_p3), %v563_v5  ;;  %s564_s23 = smov (!%p152_p3), 126   ;;  %v243_v7 = vld [vmem:[%s644_s2] sm:$0xff] (!%p152_p3)  ;;  %v245_v8 = vld [vmem:[%s644_s2 + $0x10] sm:$0xff] (!%p152_p3)  ;;  %v246_v9 = vld [vmem:[%s644_s2 + $0x18] sm:$0xff] (!%p152_p3)  ;;  %vm220_vm1 = vcmask (!%p152_p3), 1039360  }
   0x8   : > { %528 = vset.pattern.permute.xlu0 (!%p152_p3), %v563_v5  ;;  %vm236_vm2 = vcmask (!%p152_p3), 1031168   ;;  %v537_v19 = vld [vmem:[%s643_s1 + $0x8] sm:$0xff] (!%p152_p3)  }
   0xe   : > { %s651_s12 = smov (!%p178_p4, %s552_s12), 1 }
   0xf   : > { %s463_s16 = sshll.u32 %s651_s12, 5  ;;  %s464_s7 = sshll.u32 %s651_s12, 4 }
  0x10   : > { %s182_s19 = scalar_lea.vmem %s642_s0, %s463_s16  ;;  %s190_s10 = scalar_lea.vmem %s645_s3, %s464_s7 }
  0x11   : > { %v530_v0 = vld [vmem:[%s182_s19 + $0x10] ss:$8 sps:$4 sm:$0xff]   ;;  %v532_v1 = vld [vmem:[%s182_s19] ss:$8 sps:$4 sm:$0xff]   ;;  %v534_v2 = vld [vmem:[%s182_s19 + $0x14] ss:$8 sps:$4 sm:$0xff]  }
  0x12   : > { %226 = vrot.lane.b32.xlu1 %v530_v0, %s562_s20  ;;  %216 = vrot.lane.b32.xlu0 %v532_v1, %s562_s20  ;;  %v535_v3 = vld [vmem:[%s182_s19 + $0x4] ss:$8 sps:$4 sm:$0xff]  }
  0x13   : > { %487 = vmatprep.subr.bf16.mxu0 %v532_v1 }
  0x14   : > { %488 = vmatpush3.bf16.msra.mxu0 %v532_v1 }
  0x15   : > { %489 = vmatprep.subr.bf16.mxu0 %v530_v0 }
  0x16   : > { %228 = vrot.lane.b32.xlu1 %v534_v2, %s562_s20  ;;  %218 = vrot.lane.b32.xlu0 %v535_v3, %s562_s20 }
  0x18   : > { %490 = vmatpush3.bf16.msra.mxu0 %v530_v0 }
  0x1a   : > { %234 = vrot.lane.b32.xlu1 %v535_v3, %s564_s23  ;;  %232 = vrot.lane.b32.xlu0 %v532_v1, %s564_s23 }
  0x1e   : > { %254 = vperm.xlu1 %529, %v244_v6   ;;  %249 = vperm.xlu0 %528, %v243_v7  }
  0x22   : > { %259 = vperm.xlu1 %529, %v245_v8   ;;  %264 = vperm.xlu0 %528, %v246_v9  }
  0x84   : > { %v227_v10 = vpop.permute.xlu1 %226  ;;  %v217_v11 = vpop.permute.xlu0 %216 }
  0x88   : > { %v229_v12 = vpop.permute.xlu1 %228  ;;  %v219_v13 = vpop.permute.xlu0 %218 }
  0x89   : > { %v221_v14 = vsel %vm220_vm1, %v217_v11, %v219_v13  ;;  %v230_v15 = vsel %vm220_vm1, %v227_v10, %v229_v12 }
  0x8a   : > { %491 = vmatprep.subr.bf16.mxu0 %v221_v14 }
  0x8b   : > { %492 = vmatpush3.bf16.msra.mxu0 %v221_v14 }
  0x8c   : > { %v235_v16 = vpop.permute.xlu1 %234  ;;  %493 = vmatprep.subr.bf16.mxu0 %v230_v15  ;;  %v233_v17 = vpop.permute.xlu0 %232 }
  0x8d   : > { %v237_v18 = vsel %vm236_vm2, %v233_v17, %v235_v16 }
  0x8f   : > { %494 = vmatpush3.bf16.msra.mxu0 %v230_v15 }
  0x90   : > { %495 = vmatprep.subr.bf16.mxu0 %v237_v18 }
  0x93   : > { %496 = vmatpush3.bf16.msra.mxu0 %v237_v18 }
  0x96   : > { %498 = vmatmul.mubr.msk.bf16.vlgmr.msra.gmra.mrb[0].mxu0 %vm277_vm0, %v537_v19 }
  0x9d   : > { %v255_v20 = vpop.permute.xlu1 %254  ;;  %v250_v21 = vpop.permute.xlu0 %249 }
  0xa1   : > { %v260_v22 = vpop.permute.xlu1 %259  ;;  %v265_v26 = vpop.permute.xlu0 %264 }
 0x169   : > { %v499_v23 = vpop.f32.mrb[0].mxu0 }
 0x16a   : > { %v327_v24 = vadd.f32 %v499_v23, %v260_v22  ;;  %v318_v25 = vpop.f32.mrb[1].mxu0 }
 0x16b   : > { %v319_v27 = vadd.f32 %v318_v25, %v250_v21  ;;  %v500_v28 = vpop.f32.mrb[2].mxu0 }
 0x16c   : > { %v335_v29 = vmul.f32 0.1, %v327_v24  ;;  %v330_v30 = vadd.f32 %v500_v28, %v265_v26  ;;  %v321_v31 = vpop.f32.mrb[3].mxu0 }
 0x16d   : > { %v333_v32 = vmul.f32 0.1, %v319_v27  ;;  %v322_v33 = vadd.f32 %v321_v31, %v255_v20 }
 0x16e   : > { %v336_v34 = vmul.f32 0.1, %v330_v30  ;;  %v339_v36 = vmax.f32 %v327_v24, %v335_v29 }
 0x16f   : > { %v334_v35 = vmul.f32 0.1, %v322_v33  ;;  %v337_v38 = vmax.f32 %v319_v27, %v333_v32 }
 0x170   : > { %v340_v37 = vmax.f32 %v330_v30, %v336_v34 }
 0x171   : > { %v338_v39 = vmax.f32 %v322_v33, %v334_v35 }
 0x172   : > { %v477_v40 = vpack.c.bf16 %v340_v37, %v339_v36 }
 0x173   : > { %v472_v41 = vpack.c.bf16 %v338_v39, %v337_v38 }
 0x174   : > { %479 = vst [vmem:[%s190_s10 + $0x8] sm:$0xff] %v477_v40  }
 0x175   : > { %473 = vst [vmem:[%s190_s10] sm:$0xff] %v472_v41  }
 0x176 PF: > { %s13_s14 = sadd.s32 1, %s560_s14   ;;  %s646_s12 = smov %s556_s13 }
 0x177   : > { %p10_p5 = scmp.ge.s32.totalorder %s13_s14, 4   ;;  %s647_s13 = smov %s649_s15 }
 0x179   :  { %12 = sbr.rel (!%p10_p5) target bundleno = 2 (0x2), region = 63 }

// kernel: _forward_impl.7
= control target key start
LH: loop header
LB: loop body
LE: loop exit
PB: predicated region body
PF: predicated region fallthrough
CT: control target
= control target key end

     0   :  { %s905_s12 = smov 0   ;;  %s907_s13 = smov 0   ;;  %s1107_s0 = inlined_call_operand.vmem [shape: bf16[2,64,130], index: 0, kind: input, shape index: {}]   ;;  %s1108_s1 = inlined_call_operand.vmem [shape: bf16[128,192], index: 1, kind: input, shape index: {}]   ;;  %s1109_s2 = inlined_call_operand.vmem [shape: f32[128,1], index: 2, kind: input, shape index: {}]   ;;  %s1110_s3 = inlined_call_operand.vmem [shape: f32[2,128,128], index: 3, kind: output, shape index: {}]  }
   0x1   :  { %s909_s14 = smov 0  }
   0x2 LB: > { %s25_s15 = sadd.s32 1, %s876_s13  ;;  %p728_p0 = scmp.ge.s32.totalorder %s880_s14, 1  ;;  %s880_s14 = sphi %s909_s14, %s13_s14   ;;  %s876_s13 = sphi %s907_s13, %s1112_s13   ;;  %s872_s12 = sphi %s905_s12, %s1111_s12  }
   0x3   : > { %p27_p1 = scmp.ge.s32.totalorder %s25_s15, 2  ;;  %p151_p2 = scmp.lt.s32.totalorder %s880_s14, 3 }
   0x5   : > { %s1114_s15 = smov (%p27_p1, %s25_s15), 0  ;;  %p152_p3 = pnand %p728_p0, %p151_p2 }
   0x6   : > { %p178_p4 = scmp.lt.s32.totalorder (!%p152_p3), %s872_s12, 1  ;;  %v882_v0 = vmov (!%p152_p3), 0   ;;  %s883_s20 = smov (!%p152_p3), 127   ;;  %v836_v9 = vld [vmem:[%s1108_s1 + $0x4] ss:$8 sps:$4 sm:$0xff] (!%p152_p3)   ;;  %vm475_vm0 = vcmask (!%p152_p3), 523264  }
   0x7   : > { %155 = sbr.rel (%p152_p3) target bundleno = 414 (0x19e), region = 32  ;;  %500 = vmatprep.subr.bf16.mxu0 (!%p152_p3), %v882_v0  ;;  %769 = vmatprep.subr.bf16.mxu1 (!%p152_p3), %v882_v0  ;;  %s884_s21 = smov (!%p152_p3), 126   ;;  %v839_v10 = vld [vmem:[%s1108_s1 + $0x44] ss:$8 sps:$4 sm:$0xff] (!%p152_p3)   ;;  %v309_v13 = vld [vmem:[%s1109_s2 + $0x10] sm:$0xff] (!%p152_p3)  ;;  %v310_v14 = vld [vmem:[%s1109_s2 + $0x18] sm:$0xff] (!%p152_p3) }
   0x8   : > { %821 = vset.pattern.permute.xlu1 (!%p152_p3), %v882_v0  ;;  %820 = vset.pattern.permute.xlu0 (!%p152_p3), %v882_v0  ;;  %v308_v11 = vld [vmem:[%s1109_s2 + $0x8] sm:$0xff] (!%p152_p3)  ;;  %v307_v12 = vld [vmem:[%s1109_s2] sm:$0xff] (!%p152_p3)  ;;  %v313_v17 = vld [vmem:[%s1109_s2 + $0x30] sm:$0xff] (!%p152_p3)  ;;  %vm257_vm1 = vcmask (!%p152_p3), 1039360   ;;  %vm282_vm2 = vcmask (!%p152_p3), 1031168  }
   0x9   : > { %757 = vmatprep.mubr.msk.bf16.mxu0 (!%p152_p3), %vm475_vm0, %v836_v9  ;;  %761 = vmatprep.mubr.msk.bf16.mxu1 (!%p152_p3), %vm475_vm0, %v839_v10  ;;  %v311_v15 = vld [vmem:[%s1109_s2 + $0x20] sm:$0xff] (!%p152_p3)  ;;  %v312_v16 = vld [vmem:[%s1109_s2 + $0x28] sm:$0xff] (!%p152_p3)  ;;  %v314_v18 = vld [vmem:[%s1109_s2 + $0x38] sm:$0xff] (!%p152_p3) }
   0xa   : > { %v315_v19 = vld [vmem:[%s1109_s2 + $0x40] sm:$0xff] (!%p152_p3)  ;;  %v316_v20 = vld [vmem:[%s1109_s2 + $0x48] sm:$0xff] (!%p152_p3)  ;;  %v317_v21 = vld [vmem:[%s1109_s2 + $0x50] sm:$0xff] (!%p152_p3) }
   0xb   : > { %v318_v22 = vld [vmem:[%s1109_s2 + $0x58] sm:$0xff] (!%p152_p3)  ;;  %v319_v23 = vld [vmem:[%s1109_s2 + $0x60] sm:$0xff] (!%p152_p3)  ;;  %v320_v24 = vld [vmem:[%s1109_s2 + $0x68] sm:$0xff] (!%p152_p3) }
   0xc   : > { %v321_v25 = vld [vmem:[%s1109_s2 + $0x70] sm:$0xff] (!%p152_p3)  ;;  %v322_v26 = vld [vmem:[%s1109_s2 + $0x78] sm:$0xff] (!%p152_p3)  ;;  %v834_v51 = vld [vmem:[%s1108_s1] ss:$8 sps:$4 sm:$0xff] (!%p152_p3)  }
   0xd   : > { %v837_v52 = vld [vmem:[%s1108_s1 + $0x40] ss:$8 sps:$4 sm:$0xff] (!%p152_p3)   ;;  %v840_v53 = vld [vmem:[%s1108_s1 + $0x14] ss:$8 sps:$4 sm:$0xff] (!%p152_p3)   ;;  %v844_v55 = vld [vmem:[%s1108_s1 + $0x10] ss:$8 sps:$4 sm:$0xff] (!%p152_p3)  }
   0xe   : > { %s1116_s12 = smov (!%p178_p4, %s872_s12), 1  ;;  %v842_v54 = vld [vmem:[%s1108_s1 + $0x54] ss:$8 sps:$4 sm:$0xff]   ;;  %v845_v56 = vld [vmem:[%s1108_s1 + $0x50] ss:$8 sps:$4 sm:$0xff]  }
   0xf   : > { %s767_s16 = sshll.u32 %s1116_s12, 6  ;;  %v846_v57 = vld [vmem:[%s1108_s1 + $0x24] ss:$8 sps:$4 sm:$0xff]   ;;  %v850_v59 = vld [vmem:[%s1108_s1 + $0x20] ss:$8 sps:$4 sm:$0xff]   ;;  %s768_s17 = sshll.u32 %s1116_s12, 7 }
  0x10   : > { %s182_s19 = scalar_lea.vmem %s1107_s0, %s767_s16  ;;  %v848_v58 = vld [vmem:[%s1108_s1 + $0x64] ss:$8 sps:$4 sm:$0xff]   ;;  %v851_v60 = vld [vmem:[%s1108_s1 + $0x60] ss:$8 sps:$4 sm:$0xff]   ;;  %v852_v61 = vld [vmem:[%s1108_s1 + $0x34] ss:$8 sps:$4 sm:$0xff]  }
  0x11   : > { %v822_v1 = vld [vmem:[%s182_s19 + $0x10] ss:$8 sps:$4 sm:$0xff]   ;;  %v824_v2 = vld [vmem:[%s182_s19] ss:$8 sps:$4 sm:$0xff]   ;;  %v826_v3 = vld [vmem:[%s182_s19 + $0x14] ss:$8 sps:$4 sm:$0xff]  }
  0x12   : > { %245 = vrot.lane.b32.xlu1 %v822_v1, %s883_s20  ;;  %241 = vrot.lane.b32.xlu0 %v824_v2, %s883_s20  ;;  %v827_v4 = vld [vmem:[%s182_s19 + $0x4] ss:$8 sps:$4 sm:$0xff]   ;;  %v828_v6 = vld [vmem:[%s182_s19 + $0x20] ss:$8 sps:$4 sm:$0xff]  }
  0x13   : > { %501 = vmatpush1.bf16.msra.mxu0 %v824_v2  ;;  %781 = vmatpush1.bf16.msra.mxu1 %v824_v2  ;;  %v830_v5 = vld [vmem:[%s182_s19 + $0x24] ss:$8 sps:$4 sm:$0xff]   ;;  %v833_v7 = vld [vmem:[%s182_s19 + $0x34] ss:$8 sps:$4 sm:$0xff]   ;;  %v831_v8 = vld [vmem:[%s182_s19 + $0x30] ss:$8 sps:$4 sm:$0xff]  }
  0x14   : > { %502 = vmatprep.subr.bf16.mxu0 %v882_v0  ;;  %770 = vmatprep.subr.bf16.mxu1 %v882_v0  ;;  %v854_v62 = vld [vmem:[%s1108_s1 + $0x74] ss:$8 sps:$4 sm:$0xff]   ;;  %v856_v63 = vld [vmem:[%s1108_s1 + $0x30] ss:$8 sps:$4 sm:$0xff]  }
  0x16   : > { %247 = vrot.lane.b32.xlu1 %v826_v3, %s883_s20  ;;  %243 = vrot.lane.b32.xlu0 %v827_v4, %s883_s20 }
  0x17   : > { %503 = vmatpush1.bf16.msra.mxu0 %v822_v1  ;;  %782 = vmatpush1.bf16.msra.mxu1 %v822_v1 }
  0x18   : > { %504 = vmatprep.subr.bf16.mxu0 %v882_v0  ;;  %771 = vmatprep.subr.bf16.mxu1 %v882_v0 }
  0x1a   : > { %251 = vrot.lane.b32.xlu1 %v830_v5, %s883_s20  ;;  %249 = vrot.lane.b32.xlu0 %v828_v6, %s883_s20 }
  0x1b   : > { %505 = vmatpush1.bf16.msra.mxu0 %v828_v6  ;;  %783 = vmatpush1.bf16.msra.mxu1 %v828_v6 }
  0x1c   : > { %506 = vmatprep.subr.bf16.mxu0 %v882_v0  ;;  %772 = vmatprep.subr.bf16.mxu1 %v882_v0 }
  0x1e   : > { %255 = vrot.lane.b32.xlu1 %v833_v7, %s883_s20  ;;  %253 = vrot.lane.b32.xlu0 %v831_v8, %s883_s20  ;;  %s1077_s20 = scalar_lea.vmem %s1110_s3, %s768_s17 }
  0x1f   : > { %507 = vmatpush1.bf16.msra.mxu0 %v831_v8  ;;  %784 = vmatpush1.bf16.msra.mxu1 %v831_v8 }
  0x20   : > { %508 = vmatprep.subr.bf16.mxu0 %v882_v0  ;;  %773 = vmatprep.subr.bf16.mxu1 %v882_v0 }
  0x22   : > { %268 = vrot.lane.b32.xlu1 %v827_v4, %s884_s21  ;;  %266 = vrot.lane.b32.xlu0 %v824_v2, %s884_s21 }
  0x26   : > { %272 = vrot.lane.b32.xlu1 %v826_v3, %s884_s21  ;;  %270 = vrot.lane.b32.xlu0 %v822_v1, %s884_s21 }
  0x2a   : > { %276 = vrot.lane.b32.xlu1 %v830_v5, %s884_s21  ;;  %274 = vrot.lane.b32.xlu0 %v828_v6, %s884_s21 }
  0x2e   : > { %280 = vrot.lane.b32.xlu1 %v833_v7, %s884_s21  ;;  %278 = vrot.lane.b32.xlu0 %v831_v8, %s884_s21 }
  0x32   : > { %330 = vperm.xlu1 %821, %v308_v11   ;;  %325 = vperm.xlu0 %820, %v307_v12  }
  0x36   : > { %335 = vperm.xlu1 %821, %v309_v13   ;;  %340 = vperm.xlu0 %820, %v310_v14  }
  0x3a   : > { %345 = vperm.xlu1 %821, %v311_v15   ;;  %350 = vperm.xlu0 %820, %v312_v16  }
  0x3e   : > { %355 = vperm.xlu1 %821, %v313_v17   ;;  %360 = vperm.xlu0 %820, %v314_v18  }
  0x42   : > { %365 = vperm.xlu1 %821, %v315_v19   ;;  %370 = vperm.xlu0 %820, %v316_v20  }
  0x46   : > { %375 = vperm.xlu1 %821, %v317_v21   ;;  %380 = vperm.xlu0 %820, %v318_v22  }
  0x4a   : > { %385 = vperm.xlu1 %821, %v319_v23   ;;  %390 = vperm.xlu0 %820, %v320_v24  }
  0x4e   : > { %395 = vperm.xlu1 %821, %v321_v25   ;;  %400 = vperm.xlu0 %820, %v322_v26  }
  0x84   : > { %v246_v27 = vpop.permute.xlu1 %245  ;;  %v242_v28 = vpop.permute.xlu0 %241 }
  0x88   : > { %v248_v29 = vpop.permute.xlu1 %247  ;;  %v244_v30 = vpop.permute.xlu0 %243 }
  0x89   : > { %v258_v31 = vsel %vm257_vm1, %v242_v28, %v244_v30  ;;  %v259_v34 = vsel %vm257_vm1, %v246_v27, %v248_v29 }
  0x8a   : > { %509 = vmatpush1.bf16.msra.mxu0 %v258_v31  ;;  %785 = vmatpush1.bf16.msra.mxu1 %v258_v31 }
  0x8b   : > { %510 = vmatprep.subr.bf16.mxu0 %v882_v0  ;;  %774 = vmatprep.subr.bf16.mxu1 %v882_v0 }
  0x8c   : > { %v252_v32 = vpop.permute.xlu1 %251  ;;  %v250_v33 = vpop.permute.xlu0 %249 }
  0x8d   : > { %v260_v35 = vsel %vm257_vm1, %v250_v33, %v252_v32 }
  0x8e   : > { %511 = vmatpush1.bf16.msra.mxu0 %v259_v34  ;;  %786 = vmatpush1.bf16.msra.mxu1 %v259_v34 }
  0x8f   : > { %512 = vmatprep.subr.bf16.mxu0 %v882_v0  ;;  %775 = vmatprep.subr.bf16.mxu1 %v882_v0 }
  0x90   : > { %v256_v36 = vpop.permute.xlu1 %255  ;;  %v254_v37 = vpop.permute.xlu0 %253 }
  0x91   : > { %v261_v38 = vsel %vm257_vm1, %v254_v37, %v256_v36 }
  0x92   : > { %513 = vmatpush1.bf16.msra.mxu0 %v260_v35  ;;  %787 = vmatpush1.bf16.msra.mxu1 %v260_v35 }
  0x93   : > { %514 = vmatprep.subr.bf16.mxu0 %v882_v0  ;;  %776 = vmatprep.subr.bf16.mxu1 %v882_v0 }
  0x94   : > { %v269_v39 = vpop.permute.xlu1 %268  ;;  %v267_v40 = vpop.permute.xlu0 %266 }
  0x95   : > { %v283_v41 = vsel %vm282_vm2, %v267_v40, %v269_v39 }
  0x96   : > { %515 = vmatpush1.bf16.msra.mxu0 %v261_v38  ;;  %788 = vmatpush1.bf16.msra.mxu1 %v261_v38 }
  0x97   : > { %516 = vmatprep.subr.bf16.mxu0 %v882_v0  ;;  %777 = vmatprep.subr.bf16.mxu1 %v882_v0 }
  0x98   : > { %v273_v42 = vpop.permute.xlu1 %272  ;;  %v271_v43 = vpop.permute.xlu0 %270 }
  0x99   : > { %v284_v44 = vsel %vm282_vm2, %v271_v43, %v273_v42 }
  0x9a   : > { %517 = vmatpush1.bf16.msra.mxu0 %v283_v41  ;;  %789 = vmatpush1.bf16.msra.mxu1 %v283_v41 }
  0x9b   : > { %518 = vmatprep.subr.bf16.mxu0 %v882_v0  ;;  %778 = vmatprep.subr.bf16.mxu1 %v882_v0 }
  0x9c   : > { %v277_v45 = vpop.permute.xlu1 %276  ;;  %v275_v46 = vpop.permute.xlu0 %274 }
  0x9d   : > { %v285_v47 = vsel %vm282_vm2, %v275_v46, %v277_v45 }
  0x9e   : > { %519 = vmatpush1.bf16.msra.mxu0 %v284_v44  ;;  %790 = vmatpush1.bf16.msra.mxu1 %v284_v44 }
  0x9f   : > { %520 = vmatprep.subr.bf16.mxu0 %v882_v0  ;;  %779 = vmatprep.subr.bf16.mxu1 %v882_v0 }
  0xa0   : > { %v281_v48 = vpop.permute.xlu1 %280  ;;  %v279_v49 = vpop.permute.xlu0 %278 }
  0xa1   : > { %v286_v50 = vsel %vm282_vm2, %v279_v49, %v281_v48 }
  0xa2   : > { %521 = vmatpush1.bf16.msra.mxu0 %v285_v47  ;;  %791 = vmatpush1.bf16.msra.mxu1 %v285_v47 }
  0xa3   : > { %522 = vmatprep.subr.bf16.mxu0 %v882_v0  ;;  %780 = vmatprep.subr.bf16.mxu1 %v882_v0  ;;  %v857_v0 = vld [vmem:[%s1108_s1 + $0x70] ss:$8 sps:$4 sm:$0xff]  }
  0xa6   : > { %523 = vmatpush1.bf16.msra.mxu0 %v286_v50  ;;  %792 = vmatpush1.bf16.msra.mxu1 %v286_v50 }
  0xa9   : > { %533 = vmatmul.mubr.bf16.vlgmr.msra.gmra.mrb[0].mxu0 %v834_v51  ;;  %565 = vmatmul.mubr.bf16.vlgmr.msra.gmra.mrb[0].mxu1 %v837_v52 }
  0xaa   : > { %758 = vmatprep.mubr.msk.bf16.mxu0 %vm475_vm0, %v840_v53  ;;  %762 = vmatprep.mubr.msk.bf16.mxu1 %vm475_vm0, %v842_v54 }
  0xb1   : > { %541 = vmatmul.mubr.bf16.gmra.mrb[4].mxu0 %v844_v55  ;;  %573 = vmatmul.mubr.bf16.gmra.mrb[4].mxu1 %v845_v56  ;;  %v331_v1 = vpop.permute.xlu1 %330  ;;  %v326_v2 = vpop.permute.xlu0 %325 }
  0xb2   : > { %759 = vmatprep.mubr.msk.bf16.mxu0 %vm475_vm0, %v846_v57  ;;  %763 = vmatprep.mubr.msk.bf16.mxu1 %vm475_vm0, %v848_v58 }
  0xb5   : > { %v336_v3 = vpop.permute.xlu1 %335  ;;  %v341_v4 = vpop.permute.xlu0 %340 }
  0xb9   : > { %549 = vmatmul.mubr.bf16.gmra.mrb[8].mxu0 %v850_v59  ;;  %581 = vmatmul.mubr.bf16.gmra.mrb[8].mxu1 %v851_v60  ;;  %v346_v5 = vpop.permute.xlu1 %345  ;;  %v1067_v6 = vpop.permute.xlu0 %350 }
  0xba   : > { %760 = vmatprep.mubr.msk.bf16.mxu0 %vm475_vm0, %v852_v61  ;;  %764 = vmatprep.mubr.msk.bf16.mxu1 %vm475_vm0, %v854_v62 }
  0xbd   : > { %v1069_v7 = vpop.permute.xlu1 %355  ;;  %v1071_v8 = vpop.permute.xlu0 %360 }
  0xc1   : > { %557 = vmatmul.mubr.bf16.gmra.mrb[12].mxu0 %v856_v63  ;;  %589 = vmatmul.mubr.bf16.gmra.mrb[12].mxu1 %v857_v0  ;;  %v366_v9 = vpop.permute.xlu1 %365  ;;  %v371_v10 = vpop.permute.xlu0 %370 }
  0xc5   : > { %v376_v29 = vpop.permute.xlu1 %375  ;;  %v381_v30 = vpop.permute.xlu0 %380 }
  0xc9   : > { %v386_v51 = vpop.permute.xlu1 %385  ;;  %v391_v52 = vpop.permute.xlu0 %390 }
 0x17c   : > { %v534_v11 = vpop.f32.mrb[0].mxu0  ;;  %v566_v12 = vpop.f32.mrb[0].mxu1 }
 0x17d   : > { %v535_v13 = vadd.f32 %v534_v11, %v326_v2  ;;  %v567_v14 = vadd.f32 %v566_v12, %v366_v9  ;;  %v536_v15 = vpop.f32.mrb[1].mxu0  ;;  %v568_v16 = vpop.f32.mrb[1].mxu1 }
 0x17e   : > { %v537_v17 = vpop.f32.mrb[2].mxu0  ;;  %v569_v18 = vpop.f32.mrb[2].mxu1 }
 0x17f   : > { %v597_v19 = vmul.f32 0.1, %v535_v13  ;;  %v605_v20 = vmul.f32 0.1, %v567_v14  ;;  %v538_v21 = vadd.f32 %v537_v17, %v331_v1  ;;  %v570_v22 = vadd.f32 %v569_v18, %v371_v10  ;;  %v539_v23 = vpop.f32.mrb[3].mxu0  ;;  %v571_v24 = vpop.f32.mrb[3].mxu1 }
 0x180   : > { %v396_v12 = vpop.permute.xlu1 %395 }
 0x181   : > { %v613_v25 = vmax.f32 %v535_v13, %v597_v19  ;;  %v621_v26 = vmax.f32 %v567_v14, %v605_v20  ;;  %v598_v27 = vmul.f32 0.1, %v538_v21  ;;  %v606_v28 = vmul.f32 0.1, %v570_v22  ;;  %v401_v13 = vpop.permute.xlu0 %400 }
 0x183   : > { %629 = vst [vmem:[%s1077_s20] sm:$0xff] %v613_v25  ;;  %637 = vst [vmem:[%s1077_s20 + $0x40] sm:$0xff] %v621_v26  ;;  %v614_v31 = vmax.f32 %v538_v21, %v598_v27  ;;  %v622_v32 = vmax.f32 %v570_v22, %v606_v28 }
 0x184   : > { %v542_v33 = vpop.f32.mrb[4].mxu0  ;;  %v574_v34 = vpop.f32.mrb[4].mxu1 }
 0x185   : > { %630 = vst [vmem:[%s1077_s20 + $0x8] sm:$0xff] %v614_v31  ;;  %638 = vst [vmem:[%s1077_s20 + $0x48] sm:$0xff] %v622_v32  ;;  %v543_v35 = vadd.f32 %v542_v33, %v336_v3  ;;  %v575_v36 = vadd.f32 %v574_v34, %v376_v29  ;;  %v544_v37 = vpop.f32.mrb[5].mxu0  ;;  %v576_v38 = vpop.f32.mrb[5].mxu1 }
 0x186   : > { %v545_v39 = vpop.f32.mrb[6].mxu0  ;;  %v577_v40 = vpop.f32.mrb[6].mxu1 }
 0x187   : > { %v599_v41 = vmul.f32 0.1, %v543_v35  ;;  %v607_v42 = vmul.f32 0.1, %v575_v36  ;;  %v546_v43 = vadd.f32 %v545_v39, %v341_v4  ;;  %v578_v44 = vadd.f32 %v577_v40, %v381_v30  ;;  %v547_v45 = vpop.f32.mrb[7].mxu0  ;;  %v579_v46 = vpop.f32.mrb[7].mxu1 }
 0x189   : > { %v615_v47 = vmax.f32 %v543_v35, %v599_v41  ;;  %v623_v48 = vmax.f32 %v575_v36, %v607_v42  ;;  %v600_v49 = vmul.f32 0.1, %v546_v43  ;;  %v608_v50 = vmul.f32 0.1, %v578_v44 }
 0x18b   : > { %631 = vst [vmem:[%s1077_s20 + $0x10] sm:$0xff] %v615_v47  ;;  %639 = vst [vmem:[%s1077_s20 + $0x50] sm:$0xff] %v623_v48  ;;  %v616_v53 = vmax.f32 %v546_v43, %v600_v49  ;;  %v624_v54 = vmax.f32 %v578_v44, %v608_v50 }
 0x18c   : > { %v550_v55 = vpop.f32.mrb[8].mxu0  ;;  %v582_v56 = vpop.f32.mrb[8].mxu1 }
 0x18d   : > { %632 = vst [vmem:[%s1077_s20 + $0x18] sm:$0xff] %v616_v53  ;;  %640 = vst [vmem:[%s1077_s20 + $0x58] sm:$0xff] %v624_v54  ;;  %v551_v57 = vadd.f32 %v550_v55, %v346_v5  ;;  %v583_v58 = vadd.f32 %v582_v56, %v386_v51  ;;  %v552_v59 = vpop.f32.mrb[9].mxu0  ;;  %v584_v60 = vpop.f32.mrb[9].mxu1 }
 0x18e   : > { %v553_v61 = vpop.f32.mrb[10].mxu0  ;;  %v585_v62 = vpop.f32.mrb[10].mxu1 }
 0x18f   : > { %v601_v63 = vmul.f32 0.1, %v551_v57  ;;  %v609_v0 = vmul.f32 0.1, %v583_v58  ;;  %v554_v1 = vadd.f32 %v553_v61, %v1067_v6  ;;  %v586_v2 = vadd.f32 %v585_v62, %v391_v52  ;;  %v555_v3 = vpop.f32.mrb[11].mxu0  ;;  %v587_v4 = vpop.f32.mrb[11].mxu1 }
 0x191   : > { %v617_v9 = vmax.f32 %v551_v57, %v601_v63  ;;  %v625_v10 = vmax.f32 %v583_v58, %v609_v0  ;;  %v602_v11 = vmul.f32 0.1, %v554_v1  ;;  %v610_v5 = vmul.f32 0.1, %v586_v2 }
 0x193   : > { %633 = vst [vmem:[%s1077_s20 + $0x20] sm:$0xff] %v617_v9  ;;  %641 = vst [vmem:[%s1077_s20 + $0x60] sm:$0xff] %v625_v10  ;;  %v618_v14 = vmax.f32 %v554_v1, %v602_v11  ;;  %v626_v15 = vmax.f32 %v586_v2, %v610_v5 }
 0x194   : > { %v558_v16 = vpop.f32.mrb[12].mxu0  ;;  %v590_v17 = vpop.f32.mrb[12].mxu1 }
 0x195   : > { %634 = vst [vmem:[%s1077_s20 + $0x28] sm:$0xff] %v618_v14  ;;  %642 = vst [vmem:[%s1077_s20 + $0x68] sm:$0xff] %v626_v15  ;;  %v559_v6 = vadd.f32 %v558_v16, %v1069_v7  ;;  %v591_v18 = vadd.f32 %v590_v17, %v396_v12  ;;  %v560_v19 = vpop.f32.mrb[13].mxu0  ;;  %v592_v20 = vpop.f32.mrb[13].mxu1 }
 0x196   : > { %v561_v21 = vpop.f32.mrb[14].mxu0  ;;  %v593_v22 = vpop.f32.mrb[14].mxu1 }
 0x197   : > { %v603_v23 = vmul.f32 0.1, %v559_v6  ;;  %v611_v24 = vmul.f32 0.1, %v591_v18  ;;  %v562_v25 = vadd.f32 %v561_v21, %v1071_v8  ;;  %v594_v26 = vadd.f32 %v593_v22, %v401_v13  ;;  %v563_v27 = vpop.f32.mrb[15].mxu0  ;;  %v595_v28 = vpop.f32.mrb[15].mxu1 }
 0x199   : > { %v619_v29 = vmax.f32 %v559_v6, %v603_v23  ;;  %v627_v30 = vmax.f32 %v591_v18, %v611_v24  ;;  %v604_v31 = vmul.f32 0.1, %v562_v25  ;;  %v612_v7 = vmul.f32 0.1, %v594_v26 }
 0x19b   : > { %635 = vst [vmem:[%s1077_s20 + $0x30] sm:$0xff] %v619_v29  ;;  %643 = vst [vmem:[%s1077_s20 + $0x70] sm:$0xff] %v627_v30  ;;  %v620_v32 = vmax.f32 %v562_v25, %v604_v31  ;;  %v628_v33 = vmax.f32 %v594_v26, %v612_v7 }
 0x19d   : > { %636 = vst [vmem:[%s1077_s20 + $0x38] sm:$0xff] %v620_v32  ;;  %644 = vst [vmem:[%s1077_s20 + $0x78] sm:$0xff] %v628_v33 }
 0x19e PF: > { %s13_s14 = sadd.s32 1, %s880_s14   ;;  %s1111_s12 = smov %s876_s13 }
 0x19f   : > { %p10_p5 = scmp.ge.s32.totalorder %s13_s14, 4   ;;  %s1112_s13 = smov %s1114_s15 }
 0x1a1   :  { %12 = sbr.rel (!%p10_p5) target bundleno = 2 (0x2), region = 63 }

</bundles_post_ra>
